<compile_context>
chip_gen: v7x
topology: tpu7x:2x2x1
jax: 0.10.0
libtpu: 0.0.40
codegen_flags: <defaults>
</compile_context>

<pallas_src>
import jax
import jax.numpy as jnp
from jax.experimental import pallas as pl
from jax.experimental.pallas import tpu as pltpu

INPUT_SIZE = 768
HIDDEN_SIZE = 256
OUTPUT_SIZE = 3
PAD_OUT = 128  # lane-dense fc2 width (zero-padded beyond OUTPUT_SIZE)


def _round_up(n, m):
    return ((n + m - 1) // m) * m


def fusion_mlp_kernel(x_ref, w1_ref, b1_ref, w2_ref, b2_ref, o_ref):
    # fc1: cast the f32 x tile to bf16 in-kernel (VPU), MXU matmul with f32
    # accumulation; bias + ReLU in f32.
    x = x_ref[...].astype(jnp.bfloat16)
    h = jnp.dot(x, w1_ref[...], preferred_element_type=jnp.float32)
    h = jnp.maximum(h + b1_ref[...], 0.0)
    # dropout(p=0.2) is identity at inference time.
    # TODO(synk): training-mode dropout (prng mask + 1/(1-p) scale) not emitted.
    # fc2: bf16 activations into the MXU, f32 accumulate, f32 bias, bf16 store.
    out = jnp.dot(h.astype(jnp.bfloat16), w2_ref[...],
                  preferred_element_type=jnp.float32)
    o_ref[...] = (out + b2_ref[...]).astype(o_ref.dtype)


def prepare_params(w1, b1, w2, b2):
    """One-time weight prep: bf16 casts + lane-padding of the fc2 path.

    w1: [768, 256], b1: [.., 256], w2: [256, 3], b2: [.., 3].
    """
    w1_b = w1.astype(jnp.bfloat16)
    b1_f = b1.reshape(1, HIDDEN_SIZE).astype(jnp.float32)
    w2_p = jnp.zeros((HIDDEN_SIZE, PAD_OUT), jnp.bfloat16).at[:, :OUTPUT_SIZE].set(
        w2.astype(jnp.bfloat16))
    b2_p = jnp.zeros((1, PAD_OUT), jnp.float32).at[:, :OUTPUT_SIZE].set(
        b2.reshape(1, OUTPUT_SIZE).astype(jnp.float32))
    return w1_b, b1_f, w2_p, b2_p


def _choose_tile(B, tb):
    """Row tile: multiple of 8 (f32 sublane); single tile for small B; even
    tile count preferred otherwise (v7x megacore shards the parallel axis)."""
    tb = max(8, _round_up(tb, 8))
    if B <= tb:
        return _round_up(max(B, 8), 8)
    n = pl.cdiv(B, tb)
    if n > 1 and n % 2 == 1:
        tb2 = _round_up(pl.cdiv(B, n + 1), 8)
        if tb2 >= 8 and pl.cdiv(B, tb2) % 2 == 0:
            return tb2
    return tb


def fusion_model_forward(x, params, *, tb=512):
    """x: [B, 768] f32.  params: output of prepare_params()."""
    w1_b, b1_f, w2_p, b2_p = params
    B = x.shape[0]
    orig_dtype = x.dtype

    TB = _choose_tile(B, tb)
    n_tiles = pl.cdiv(B, TB)

    # VMEM budget: double-buffered f32 x tile + bf16 out tile + resident
    # weights (~0.5 MiB), with slack; clamped to 48 MiB for v7x's 64 MiB VMEM.
    est = 2 * TB * INPUT_SIZE * 4 + 2 * TB * PAD_OUT * 2 + (1 << 20)
    vmem_limit = int(min(48 << 20, max(16 << 20, 2 * est)))

    out_padded = pl.pallas_call(
        fusion_mlp_kernel,
        out_shape=jax.ShapeDtypeStruct((B, PAD_OUT), jnp.bfloat16),
        grid=(n_tiles,),
        in_specs=[
            pl.BlockSpec((TB, INPUT_SIZE), lambda i: (i, 0)),          # x (streamed f32)
            pl.BlockSpec((INPUT_SIZE, HIDDEN_SIZE), lambda i: (0, 0)), # W1 (resident)
            pl.BlockSpec((1, HIDDEN_SIZE), lambda i: (0, 0)),          # b1 (resident)
            pl.BlockSpec((HIDDEN_SIZE, PAD_OUT), lambda i: (0, 0)),    # W2 (resident)
            pl.BlockSpec((1, PAD_OUT), lambda i: (0, 0)),              # b2 (resident)
        ],
        out_specs=pl.BlockSpec((TB, PAD_OUT), lambda i: (i, 0)),
        compiler_params=pltpu.CompilerParams(
            dimension_semantics=("parallel",),
            vmem_limit_bytes=vmem_limit,
        ),
    )(x, w1_b, b1_f, w2_p, b2_p)

    return out_padded[:B, :OUTPUT_SIZE].astype(orig_dtype)


def init_params(key):
    # Deterministic init mimicking nn.Linear's uniform(-1/sqrt(fan_in), +1/sqrt(fan_in)).
    k1, k2, k3, k4 = jax.random.split(key, 4)
    bound1 = 1.0 / jnp.sqrt(INPUT_SIZE)
    bound2 = 1.0 / jnp.sqrt(HIDDEN_SIZE)
    w1 = jax.random.uniform(k1, (INPUT_SIZE, HIDDEN_SIZE), jnp.float32, -bound1, bound1)
    b1 = jax.random.uniform(k2, (1, HIDDEN_SIZE), jnp.float32, -bound1, bound1)
    w2 = jax.random.uniform(k3, (HIDDEN_SIZE, OUTPUT_SIZE), jnp.float32, -bound2, bound2)
    b2 = jax.random.uniform(k4, (1, OUTPUT_SIZE), jnp.float32, -bound2, bound2)
    return w1, b1, w2, b2


if __name__ == "__main__":
    key = jax.random.PRNGKey(0)
    kx, kp = jax.random.split(key)

    B = 40
    x = jax.random.normal(kx, (B, INPUT_SIZE), jnp.float32)
    w1, b1, w2, b2 = init_params(kp)
    params = prepare_params(w1, b1, w2, b2)

    # Reference with matching bf16-input / f32-accumulate numerics.
    xb = x.astype(jnp.bfloat16)
    w1b = w1.astype(jnp.bfloat16)
    w2b = w2.astype(jnp.bfloat16)
    h = jnp.maximum(jnp.dot(xb, w1b, preferred_element_type=jnp.float32) + b1, 0.0)
    ref = jnp.dot(h.astype(jnp.bfloat16), w2b, preferred_element_type=jnp.float32) + b2
    ref32 = jnp.maximum(x @ w1 + b1, 0.0) @ w2 + b2

    # 1) Default path: small batch collapses to a single grid step.
    out = jax.block_until_ready(fusion_model_forward(x, params))
    assert out.shape == (B, OUTPUT_SIZE)
    assert jnp.allclose(out, ref, atol=2e-2, rtol=2e-2)
    assert jnp.allclose(out, ref32, atol=5e-2, rtol=5e-2)

    # 2) Correctness check of the multi-tile + ragged-last-tile path
    #    (B=40, TB=16 -> 3 tiles, last tile partial; junk tail rows sliced off).
    out_tiled = jax.block_until_ready(fusion_model_forward(x, params, tb=16))
    assert out_tiled.shape == (B, OUTPUT_SIZE)
    assert jnp.allclose(out_tiled, ref, atol=2e-2, rtol=2e-2)

    print("KERNEL_OK")
</pallas_src>

<mosaic_0001>
module attributes {stable_mosaic.version = 11 : i64} {
  func.func @fusion_mlp_kernel(%arg0: i32, %arg1: memref<40x768xf32, #tpu.memory_space<vmem>>, %arg2: memref<768x256xbf16, #tpu.memory_space<vmem>>, %arg3: memref<1x256xf32, #tpu.memory_space<vmem>>, %arg4: memref<256x128xbf16, #tpu.memory_space<vmem>>, %arg5: memref<1x128xf32, #tpu.memory_space<vmem>>, %arg6: memref<40x128xbf16, #tpu.memory_space<vmem>>) attributes {dimension_semantics = [#tpu.dimension_semantics<parallel>], iteration_bounds = array<i64: 1>, scalar_prefetch = 0 : i64, scratch_operands = 0 : i64, tpu.core_type = #tpu.core_type<tc>, window_params = [{transform_indices = @transform_0, window_bounds = array<i64: 40, 768>}, {pipeline_mode = #tpu.pipeline_mode<synchronous>, transform_indices = @transform_1, window_bounds = array<i64: 768, 256>}, {pipeline_mode = #tpu.pipeline_mode<synchronous>, transform_indices = @transform_2, window_bounds = array<i64: 1, 256>}, {pipeline_mode = #tpu.pipeline_mode<synchronous>, transform_indices = @transform_3, window_bounds = array<i64: 256, 128>}, {pipeline_mode = #tpu.pipeline_mode<synchronous>, transform_indices = @transform_4, window_bounds = array<i64: 1, 128>}, {transform_indices = @transform_5, window_bounds = array<i64: 40, 128>}]} {
    %c0 = arith.constant 0 : index
    %c0_0 = arith.constant 0 : index
    %0 = vector.load %arg1[%c0, %c0_0] : memref<40x768xf32, #tpu.memory_space<vmem>>, vector<40x768xf32>
    %1 = arith.truncf %0 : vector<40x768xf32> to vector<40x768xbf16>
    %c0_1 = arith.constant 0 : index
    %c0_2 = arith.constant 0 : index
    %2 = vector.load %arg2[%c0_1, %c0_2] : memref<768x256xbf16, #tpu.memory_space<vmem>>, vector<768x256xbf16>
    %cst = arith.constant dense<0.000000e+00> : vector<40x256xf32>
    %3 = tpu.matmul %1, %2, %cst {dimension_numbers = #tpu.dot_dimension_numbers<[1], [0], [0], [1], [0, 0, 1, 1], [], []>} : vector<40x768xbf16>, vector<768x256xbf16>, vector<40x256xf32> -> vector<40x256xf32>
    %c0_3 = arith.constant 0 : index
    %c0_4 = arith.constant 0 : index
    %4 = vector.load %arg3[%c0_3, %c0_4] : memref<1x256xf32, #tpu.memory_space<vmem>>, vector<1x256xf32>
    %5 = vector.broadcast %4 : vector<1x256xf32> to vector<40x256xf32>
    %6 = arith.addf %3, %5 : vector<40x256xf32>
    %cst_5 = arith.constant 0.000000e+00 : f32
    %7 = vector.broadcast %cst_5 : f32 to vector<40x256xf32>
    %8 = arith.maximumf %6, %7 : vector<40x256xf32>
    %9 = arith.truncf %8 : vector<40x256xf32> to vector<40x256xbf16>
    %c0_6 = arith.constant 0 : index
    %c0_7 = arith.constant 0 : index
    %10 = vector.load %arg4[%c0_6, %c0_7] : memref<256x128xbf16, #tpu.memory_space<vmem>>, vector<256x128xbf16>
    %cst_8 = arith.constant dense<0.000000e+00> : vector<40x128xf32>
    %11 = tpu.matmul %9, %10, %cst_8 {dimension_numbers = #tpu.dot_dimension_numbers<[1], [0], [0], [1], [0, 0, 1, 1], [], []>} : vector<40x256xbf16>, vector<256x128xbf16>, vector<40x128xf32> -> vector<40x128xf32>
    %c0_9 = arith.constant 0 : index
    %c0_10 = arith.constant 0 : index
    %12 = vector.load %arg5[%c0_9, %c0_10] : memref<1x128xf32, #tpu.memory_space<vmem>>, vector<1x128xf32>
    %13 = vector.broadcast %12 : vector<1x128xf32> to vector<40x128xf32>
    %14 = arith.addf %11, %13 : vector<40x128xf32>
    %15 = arith.truncf %14 : vector<40x128xf32> to vector<40x128xbf16>
    %c0_11 = arith.constant 0 : index
    %c0_12 = arith.constant 0 : index
    %16 = vector.load %arg6[%c0_11, %c0_12] : memref<40x128xbf16, #tpu.memory_space<vmem>>, vector<40x128xbf16>
    tpu.vector_store %arg6[%c0_11, %c0_12], %15 {strides = array<i32>} : memref<40x128xbf16, #tpu.memory_space<vmem>>, vector<40x128xbf16>,
    return
  }
  func.func @transform_0(%arg0: i32) -> (i32, i32) {
    %c0_i32 = arith.constant 0 : i32
    %c0_i32_0 = arith.constant 0 : i32
    return %arg0, %c0_i32 : i32, i32
  }
  func.func @transform_1(%arg0: i32) -> (i32, i32) {
    %c0_i32 = arith.constant 0 : i32
    %c0_i32_0 = arith.constant 0 : i32
    %c0_i32_1 = arith.constant 0 : i32
    return %c0_i32, %c0_i32_0 : i32, i32
  }
  func.func @transform_2(%arg0: i32) -> (i32, i32) {
    %c0_i32 = arith.constant 0 : i32
    %c0_i32_0 = arith.constant 0 : i32
    %c0_i32_1 = arith.constant 0 : i32
    return %c0_i32, %c0_i32_0 : i32, i32
  }
  func.func @transform_3(%arg0: i32) -> (i32, i32) {
    %c0_i32 = arith.constant 0 : i32
    %c0_i32_0 = arith.constant 0 : i32
    %c0_i32_1 = arith.constant 0 : i32
    return %c0_i32, %c0_i32_0 : i32, i32
  }
  func.func @transform_4(%arg0: i32) -> (i32, i32) {
    %c0_i32 = arith.constant 0 : i32
    %c0_i32_0 = arith.constant 0 : i32
    %c0_i32_1 = arith.constant 0 : i32
    return %c0_i32, %c0_i32_0 : i32, i32
  }
  func.func @transform_5(%arg0: i32) -> (i32, i32) {
    %c0_i32 = arith.constant 0 : i32
    %c0_i32_0 = arith.constant 0 : i32
    return %arg0, %c0_i32 : i32, i32
  }
}

</mosaic_0001>

<bundles_post_ra>
// kernel: tpu_custom_call.1
= control target key start
LH: loop header
LB: loop body
LE: loop exit
PB: predicated region body
PF: predicated region fallthrough
CT: control target
= control target key end

     0   :  { %10 = vsyncpa [#allocation3], 0  ;;  %s1697_s0 = inlined_call_operand.hbm [shape: f32[40,768], index: 0, kind: input, shape index: {}]   ;;  %s1698_s1 = inlined_call_operand.hbm [shape: bf16[768,256], index: 1, kind: input, shape index: {}]   ;;  %s1699_s2 = inlined_call_operand.vmem [shape: f32[1,256], index: 2, kind: input, shape index: {}]   ;;  %s1700_s3 = inlined_call_operand.hbm [shape: bf16[256,128], index: 3, kind: input, shape index: {}]   ;;  %s1701_s4 = inlined_call_operand.vmem [shape: f32[1,128], index: 4, kind: input, shape index: {}]   ;;  %s1702_s5 = inlined_call_operand.hbm [shape: bf16[40,128], index: 5, kind: output, shape index: {}]  }
   0x1   :  { %11 = vsyncpa [#allocation6], 0 }
   0x2   :  { %12 = vsyncpa [#allocation4], 0  ;;  %s1597_s18 = smov [#allocation5]   ;;  %s1503_s22 = scalar_lea.hbm %s1698_s1, 12288 }
   0x3   :  { %s30_s19 = sshll.u32 %s1597_s18, 4  ;;  %p1504_p0 = scmp.ne.s32.totalorder %s1698_s1, %s1503_s22  ;;  %s31_s19 = int_to_ptr.vmem [resolvable:$true] %s30_s19 }
   0x4   :  { %p1507_p1 = scmp.lt.u32.totalorder %s1503_s22, %s1698_s1 }
   0x6   :  { %p1509_p2 = pnand %p1507_p1, %p1504_p0 }
   0x8   :  { %1512 = shalt.err (!%p1509_p2)
}
   0x9   :  { %s1513_s27 = scalar_lea.vmem %s31_s19, 12288  ;;  %p1518_p4 = scmp.lt.s32.totalorder %s31_s19, %s31_s19 }
   0xa   :  { %p1514_p3 = scmp.ne.s32.totalorder %s31_s19, %s1513_s27  ;;  %p1519_p5 = scmp.lt.s32.totalorder %s1513_s27, %s1513_s27 }
   0xc   :  { %p1520_p6 = por %p1519_p5, %p1518_p4 }
   0xe   :  { %p1521_p7 = pnand %p1520_p6, %p1514_p3 }
  0x10   :  { %1524 = shalt.err (!%p1521_p7)
}
  0x11   :  { %s1598_s28 = smov 128   ;;  %s1599_s29 = smov 8  }
  0x12   :  { %36 = dma.hbm_to_vmem [thread:$0]  %s1698_s1, 12288, %s31_s19, [#allocation6], %s1598_s28, %s1598_s28, %s1599_s29  }
  0x13   :  { %s1600_s7 = smov [#allocation2]   ;;  %s1525_s11 = scalar_lea.hbm %s1697_s0, 3840 }
  0x14   :  { %s18_s8 = sshll.u32 %s1600_s7, 4  ;;  %p1526_p8 = scmp.ne.s32.totalorder %s1697_s0, %s1525_s11  ;;  %s19_s8 = int_to_ptr.vmem [resolvable:$true] %s18_s8 }
  0x15   :  { %p1529_p9 = scmp.lt.u32.totalorder %s1525_s11, %s1697_s0 }
  0x17   :  { %p1531_p10 = pnand %p1529_p9, %p1526_p8 }
  0x19   :  { %1534 = shalt.err (!%p1531_p10)
}
  0x1a   :  { %s1535_s16 = scalar_lea.vmem %s19_s8, 3840  ;;  %p1540_p12 = scmp.lt.s32.totalorder %s19_s8, %s19_s8 }
  0x1b   :  { %p1536_p11 = scmp.ne.s32.totalorder %s19_s8, %s1535_s16  ;;  %p1541_p13 = scmp.lt.s32.totalorder %s1535_s16, %s1535_s16 }
  0x1d   :  { %p1542_p0 = por %p1541_p13, %p1540_p12 }
  0x1f   :  { %p1543_p1 = pnand %p1542_p0, %p1536_p11 }
  0x21   :  { %1546 = shalt.err (!%p1543_p1)
}
  0x22   :  { %s1601_s1 = smov 768   ;;  %s1602_s17 = smov 48  }
  0x23   :  { %24 = dma.hbm_to_vmem [thread:$0]  %s1697_s0, 3840, %s19_s8, [#allocation3], %s1601_s1, %s1601_s1, %s1602_s17  }
  0x24   :  { %s1603_s20 = smov [#allocation7]   ;;  %s1547_s24 = scalar_lea.hbm %s1700_s3, 2048 }
  0x25   :  { %s44_s21 = sshll.u32 %s1603_s20, 4  ;;  %p1548_p2 = scmp.ne.s32.totalorder %s1700_s3, %s1547_s24  ;;  %s45_s21 = int_to_ptr.vmem [resolvable:$true] %s44_s21 }
  0x26   :  { %p1551_p3 = scmp.lt.u32.totalorder %s1547_s24, %s1700_s3 }
  0x28   :  { %p1553_p4 = pnand %p1551_p3, %p1548_p2 }
  0x2a   :  { %1556 = shalt.err (!%p1553_p4)
}
  0x2b   :  { %s1557_s29 = scalar_lea.vmem %s45_s21, 2048  ;;  %p1562_p6 = scmp.lt.s32.totalorder %s45_s21, %s45_s21 }
  0x2c   :  { %p1558_p5 = scmp.ne.s32.totalorder %s45_s21, %s1557_s29  ;;  %p1563_p7 = scmp.lt.s32.totalorder %s1557_s29, %s1557_s29 }
  0x2e   :  { %p1564_p8 = por %p1563_p7, %p1562_p6 }
  0x30   :  { %p1565_p9 = pnand %p1564_p8, %p1558_p5 }
  0x32   :  { %1568 = shalt.err (!%p1565_p9)
}
  0x33   :  { %s1604_s0 = smov 64   ;;  %s1605_s30 = smov 4  }
  0x34   :  { %50 = dma.hbm_to_vmem [thread:$0]  %s1700_s3, 2048, %s45_s21, [#allocation6], %s1604_s0, %s1604_s0, %s1605_s30  }
  0x35   :  { %1591 = dma.done.wait [#allocation3], 3840  }
  0x36   :  { %1592 = vsyncadd [#allocation3], 4294963456 }
  0x37   :  { %1593 = dma.done.wait [#allocation6], 14336  }
  0x38   :  { %1594 = vsyncadd [#allocation6], 4294952960  ;;  %v1343_v0 = vld [vmem:[#allocation5 + $0x104] ss:$8 sps:$4 sm:$0xff]   ;;  %v1345_v1 = vld [vmem:[#allocation5 + $0x100] ss:$8 sps:$4 sm:$0xff]  }
  0x39   :  { %760 = vmatprep.subr.bf16.mxu0 %v1343_v0  ;;  %v1346_v2 = vld [vmem:[#allocation5 + $0x114] ss:$8 sps:$4 sm:$0xff]   ;;  %v1348_v3 = vld [vmem:[#allocation5 + $0x110] ss:$8 sps:$4 sm:$0xff]   ;;  %v1349_v4 = vld [vmem:[#allocation5 + $0x124] ss:$8 sps:$4 sm:$0xff]  }
  0x3a   :  { %761 = vmatpush1.bf16.msra.mxu0 %v1345_v1  ;;  %v1351_v5 = vld [vmem:[#allocation5 + $0x120] ss:$8 sps:$4 sm:$0xff]   ;;  %v1352_v6 = vld [vmem:[#allocation5 + $0x134] ss:$8 sps:$4 sm:$0xff]   ;;  %v1354_v7 = vld [vmem:[#allocation5 + $0x130] ss:$8 sps:$4 sm:$0xff]  }
  0x3b   :  { %762 = vmatprep.subr.bf16.mxu0 %v1346_v2  ;;  %v1355_v8 = vld [vmem:[#allocation5 + $0x144] ss:$8 sps:$4 sm:$0xff]   ;;  %v1357_v9 = vld [vmem:[#allocation5 + $0x140] ss:$8 sps:$4 sm:$0xff]   ;;  %v1358_v10 = vld [vmem:[#allocation5 + $0x154] ss:$8 sps:$4 sm:$0xff]  }
  0x3c   :  { %v1360_v11 = vld [vmem:[#allocation5 + $0x150] ss:$8 sps:$4 sm:$0xff]   ;;  %v1361_v12 = vld [vmem:[#allocation5 + $0x164] ss:$8 sps:$4 sm:$0xff]   ;;  %v1390_v14 = vld [vmem:[#allocation5] ss:$8 sps:$4 sm:$0xff]  }
  0x3d   :  { %v1388_v13 = vld [vmem:[#allocation5 + $0x4] ss:$8 sps:$4 sm:$0xff]   ;;  %v1363_v15 = vld [vmem:[#allocation5 + $0x160] ss:$8 sps:$4 sm:$0xff]   ;;  %v1364_v16 = vld [vmem:[#allocation5 + $0x174] ss:$8 sps:$4 sm:$0xff]  }
  0x3e   :  { %763 = vmatpush1.bf16.msra.mxu0 %v1348_v3  ;;  %699 = vmatprep.subr.bf16.mxu1 %v1388_v13  ;;  %v1394_v17 = vld [vmem:[#allocation5 + $0x14] ss:$8 sps:$4 sm:$0xff]   ;;  %v1396_v18 = vld [vmem:[#allocation5 + $0x10] ss:$8 sps:$4 sm:$0xff]   ;;  %v66_v19 = vld [vmem:[#allocation2 + $0x18] sm:$0xff] }
  0x3f   :  { %764 = vmatprep.subr.bf16.mxu0 %v1349_v4  ;;  %700 = vmatpush1.bf16.msra.mxu1 %v1390_v14  ;;  %v72_v20 = vld [vmem:[#allocation2 + $0x48] sm:$0xff]  ;;  %v1400_v23 = vld [vmem:[#allocation5 + $0x24] ss:$8 sps:$4 sm:$0xff]   ;;  %v1402_v24 = vld [vmem:[#allocation5 + $0x20] ss:$8 sps:$4 sm:$0xff]  }
  0x40   :  { %701 = vmatprep.subr.bf16.mxu1 %v1394_v17  ;;  %v96_v21 = vpack.c.bf16 %v72_v20, %v66_v19  ;;  %v1366_v22 = vld [vmem:[#allocation5 + $0x170] ss:$8 sps:$4 sm:$0xff]   ;;  %v1367_v25 = vld [vmem:[#allocation5 + $0x184] ss:$8 sps:$4 sm:$0xff]   ;;  %v1369_v26 = vld [vmem:[#allocation5 + $0x180] ss:$8 sps:$4 sm:$0xff]  }
  0x41   :  { %v1406_v27 = vld [vmem:[#allocation5 + $0x34] ss:$8 sps:$4 sm:$0xff]   ;;  %v1408_v29 = vld [vmem:[#allocation5 + $0x30] ss:$8 sps:$4 sm:$0xff]   ;;  %v1412_v30 = vld [vmem:[#allocation5 + $0x44] ss:$8 sps:$4 sm:$0xff]  }
  0x42   :  { %765 = vmatpush1.bf16.msra.mxu0 %v1351_v5  ;;  %792 = vmatprep.mubr.bf16.mxu0 %v96_v21  ;;  %v1370_v28 = vld [vmem:[#allocation5 + $0x194] ss:$8 sps:$4 sm:$0xff]   ;;  %v1372_v31 = vld [vmem:[#allocation5 + $0x190] ss:$8 sps:$4 sm:$0xff]   ;;  %v1373_v32 = vld [vmem:[#allocation5 + $0x1a4] ss:$8 sps:$4 sm:$0xff]  }
  0x43   :  { %766 = vmatprep.subr.bf16.mxu0 %v1352_v6  ;;  %702 = vmatpush1.bf16.msra.mxu1 %v1396_v18  ;;  %v1414_v33 = vld [vmem:[#allocation5 + $0x40] ss:$8 sps:$4 sm:$0xff]   ;;  %v1418_v34 = vld [vmem:[#allocation5 + $0x54] ss:$8 sps:$4 sm:$0xff]   ;;  %v1420_v37 = vld [vmem:[#allocation5 + $0x50] ss:$8 sps:$4 sm:$0xff]  }
  0x44   :  { %703 = vmatprep.subr.bf16.mxu1 %v1400_v23  ;;  %v1375_v35 = vld [vmem:[#allocation5 + $0x1a0] ss:$8 sps:$4 sm:$0xff]   ;;  %v1376_v36 = vld [vmem:[#allocation5 + $0x1b4] ss:$8 sps:$4 sm:$0xff]   ;;  %v1424_v38 = vld [vmem:[#allocation5 + $0x64] ss:$8 sps:$4 sm:$0xff]  }
  0x45   :  { %v1378_v39 = vld [vmem:[#allocation5 + $0x1b0] ss:$8 sps:$4 sm:$0xff]   ;;  %v1379_v40 = vld [vmem:[#allocation5 + $0x1c4] ss:$8 sps:$4 sm:$0xff]   ;;  %v1426_v41 = vld [vmem:[#allocation5 + $0x60] ss:$8 sps:$4 sm:$0xff]  }
  0x46   :  { %767 = vmatpush1.bf16.msra.mxu0 %v1354_v7  ;;  %v1430_v42 = vld [vmem:[#allocation5 + $0x74] ss:$8 sps:$4 sm:$0xff]   ;;  %v1381_v43 = vld [vmem:[#allocation5 + $0x1c0] ss:$8 sps:$4 sm:$0xff]   ;;  %v1432_v45 = vld [vmem:[#allocation5 + $0x70] ss:$8 sps:$4 sm:$0xff]  }
  0x47   :  { %768 = vmatprep.subr.bf16.mxu0 %v1355_v8  ;;  %704 = vmatpush1.bf16.msra.mxu1 %v1402_v24  ;;  %v1382_v44 = vld [vmem:[#allocation5 + $0x1d4] ss:$8 sps:$4 sm:$0xff]   ;;  %v1436_v46 = vld [vmem:[#allocation5 + $0x84] ss:$8 sps:$4 sm:$0xff]   ;;  %v1384_v47 = vld [vmem:[#allocation5 + $0x1d0] ss:$8 sps:$4 sm:$0xff]  }
  0x48   :  { %705 = vmatprep.subr.bf16.mxu1 %v1406_v27  ;;  %v1385_v48 = vld [vmem:[#allocation5 + $0x1e4] ss:$8 sps:$4 sm:$0xff]   ;;  %v1438_v49 = vld [vmem:[#allocation5 + $0x80] ss:$8 sps:$4 sm:$0xff]   ;;  %v1442_v50 = vld [vmem:[#allocation5 + $0x94] ss:$8 sps:$4 sm:$0xff]  }
  0x49   :  { %v1387_v51 = vld [vmem:[#allocation5 + $0x1e0] ss:$8 sps:$4 sm:$0xff]   ;;  %v1391_v52 = vld [vmem:[#allocation5 + $0x1f4] ss:$8 sps:$4 sm:$0xff]   ;;  %v1444_v53 = vld [vmem:[#allocation5 + $0x90] ss:$8 sps:$4 sm:$0xff]  }
  0x4a   :  { %769 = vmatpush1.bf16.msra.mxu0 %v1357_v9  ;;  %v1448_v54 = vld [vmem:[#allocation5 + $0xa4] ss:$8 sps:$4 sm:$0xff]   ;;  %v1393_v55 = vld [vmem:[#allocation5 + $0x1f0] ss:$8 sps:$4 sm:$0xff]   ;;  %v1450_v59 = vld [vmem:[#allocation5 + $0xa0] ss:$8 sps:$4 sm:$0xff]  }
  0x4b   :  { %770 = vmatprep.subr.bf16.mxu0 %v1358_v10  ;;  %706 = vmatpush1.bf16.msra.mxu1 %v1408_v29  ;;  %v1399_v56 = vld [vmem:[#allocation5 + $0x204] ss:$8 sps:$4 sm:$0xff]   ;;  %v71_v58 = vld [vmem:[#allocation2 + $0x40] sm:$0xff]  ;;  %v84_v63 = vld [vmem:[#allocation2 + $0xa8] sm:$0xff] }
  0x4c   :  { %707 = vmatprep.subr.bf16.mxu1 %v1412_v30  ;;  %v65_v57 = vld [vmem:[#allocation2 + $0x10] sm:$0xff]  ;;  %v1454_v60 = vld [vmem:[#allocation5 + $0xb4] ss:$8 sps:$4 sm:$0xff]   ;;  %v78_v62 = vld [vmem:[#allocation2 + $0x78] sm:$0xff] }
  0x4d   :  { %v95_v61 = vpack.c.bf16 %v71_v58, %v65_v57  ;;  %v1397_v0 = vld [vmem:[#allocation5 + $0x200] ss:$8 sps:$4 sm:$0xff]   ;;  %v1456_v1 = vld [vmem:[#allocation5 + $0xb0] ss:$8 sps:$4 sm:$0xff]   ;;  %v1405_v2 = vld [vmem:[#allocation5 + $0x214] ss:$8 sps:$4 sm:$0xff]   ;;  %v102_v6 = vpack.c.bf16 %v84_v63, %v78_v62 }
  0x4e   :  { %771 = vmatpush1.bf16.msra.mxu0 %v1360_v11  ;;  %v1460_v3 = vld [vmem:[#allocation5 + $0xc4] ss:$8 sps:$4 sm:$0xff]   ;;  %v1403_v4 = vld [vmem:[#allocation5 + $0x210] ss:$8 sps:$4 sm:$0xff]   ;;  %v1462_v5 = vld [vmem:[#allocation5 + $0xc0] ss:$8 sps:$4 sm:$0xff]  }
  0x4f   :  { %772 = vmatprep.subr.bf16.mxu0 %v1361_v12  ;;  %708 = vmatpush1.bf16.msra.mxu1 %v1414_v33  ;;  %v77_v7 = vld [vmem:[#allocation2 + $0x70] sm:$0xff]  ;;  %v64_v8 = vld [vmem:[#allocation2 + $0x8] sm:$0xff]  ;;  %v70_v9 = vld [vmem:[#allocation2 + $0x38] sm:$0xff] }
  0x50   :  { %709 = vmatprep.subr.bf16.mxu1 %v1418_v34  ;;  %v83_v10 = vld [vmem:[#allocation2 + $0xa0] sm:$0xff]  ;;  %v94_v11 = vpack.c.bf16 %v70_v9, %v64_v8  ;;  %v1411_v12 = vld [vmem:[#allocation5 + $0x224] ss:$8 sps:$4 sm:$0xff]   ;;  %v1474_v21 = vld [vmem:[#allocation5 + $0xe0] ss:$8 sps:$4 sm:$0xff]  }
  0x51   :  { %v1466_v13 = vld [vmem:[#allocation5 + $0xd4] ss:$8 sps:$4 sm:$0xff]   ;;  %v101_v14 = vpack.c.bf16 %v83_v10, %v77_v7  ;;  %v1468_v17 = vld [vmem:[#allocation5 + $0xd0] ss:$8 sps:$4 sm:$0xff]   ;;  %v1472_v19 = vld [vmem:[#allocation5 + $0xe4] ss:$8 sps:$4 sm:$0xff]  }
  0x52   :  { %773 = vmatpush1.bf16.msra.mxu0 %v1363_v15  ;;  %731 = vmatprep.mubr.bf16.mxu1 %v94_v11  ;;  %v90_v15 = vld [vmem:[#allocation2 + $0xd8] sm:$0xff]  ;;  %v1417_v18 = vld [vmem:[#allocation5 + $0x234] ss:$8 sps:$4 sm:$0xff]   ;;  %v1415_v20 = vld [vmem:[#allocation5 + $0x230] ss:$8 sps:$4 sm:$0xff]  }
  0x53   :  { %774 = vmatprep.subr.bf16.mxu0 %v1364_v16  ;;  %710 = vmatpush1.bf16.msra.mxu1 %v1420_v37  ;;  %v1409_v16 = vld [vmem:[#allocation5 + $0x220] ss:$8 sps:$4 sm:$0xff]   ;;  %v1423_v23 = vld [vmem:[#allocation5 + $0x244] ss:$8 sps:$4 sm:$0xff]   ;;  %v1478_v24 = vld [vmem:[#allocation5 + $0xf4] ss:$8 sps:$4 sm:$0xff]  }
  0x54   :  { %711 = vmatprep.subr.bf16.mxu1 %v1424_v38  ;;  %v1421_v27 = vld [vmem:[#allocation5 + $0x240] ss:$8 sps:$4 sm:$0xff]   ;;  %v63_v29 = vld [vmem:[#allocation2] sm:$0xff]  ;;  %v76_v34 = vld [vmem:[#allocation2 + $0x68] sm:$0xff] }
  0x55   :  { %v74_v30 = vld [vmem:[#allocation2 + $0x58] sm:$0xff]  ;;  %v69_v33 = vld [vmem:[#allocation2 + $0x30] sm:$0xff]  ;;  %v1427_v37 = vld [vmem:[#allocation5 + $0x250] ss:$8 sps:$4 sm:$0xff]  }
  0x56   :  { %775 = vmatpush1.bf16.msra.mxu0 %v1366_v22  ;;  %v108_v22 = vpack.c.bf16 %v90_v15, %v90_v15  ;;  %v1487_v38 = vld [vmem:[#allocation7 + $0x40] sm:$0xff]   ;;  %v87_v58 = vld [vmem:[#allocation2 + $0xc0] sm:$0xff] }
  0x57   :  { %776 = vmatprep.subr.bf16.mxu0 %v1367_v25  ;;  %712 = vmatpush1.bf16.msra.mxu1 %v1426_v41  ;;  %v89_v25 = vld [vmem:[#allocation2 + $0xd0] sm:$0xff]  ;;  %v1451_v62 = vld [vmem:[#allocation5 + $0x290] ss:$8 sps:$4 sm:$0xff]   ;;  %v1486_v9 = vld [vmem:[#allocation5 + $0x2f4] ss:$8 sps:$4 sm:$0xff]  }
  0x58   :  { %713 = vmatprep.subr.bf16.mxu1 %v1430_v42  ;;  %v1488_v41 = vld [vmem:[#allocation7] sm:$0xff]   ;;  %v1484_v10 = vld [vmem:[#allocation5 + $0x2f0] ss:$8 sps:$4 sm:$0xff]  }
  0x59   :  { %v1445_v57 = vld [vmem:[#allocation5 + $0x280] ss:$8 sps:$4 sm:$0xff]   ;;  %v1459_v63 = vld [vmem:[#allocation5 + $0x2a4] ss:$8 sps:$4 sm:$0xff]   ;;  %v67_v11 = vld [vmem:[#allocation2 + $0x20] sm:$0xff] }
  0x5a   :  { %777 = vmatpush1.bf16.msra.mxu0 %v1369_v26  ;;  %v68_v26 = vld [vmem:[#allocation2 + $0x28] sm:$0xff]  ;;  %v1483_v7 = vld [vmem:[#allocation5 + $0x2e4] ss:$8 sps:$4 sm:$0xff]   ;;  %v1481_v8 = vld [vmem:[#allocation5 + $0x2e0] ss:$8 sps:$4 sm:$0xff]  }
  0x5b   :  { %778 = vmatprep.subr.bf16.mxu0 %v1370_v28  ;;  %714 = vmatpush1.bf16.msra.mxu1 %v1432_v45  ;;  %v1480_v28 = vld [vmem:[#allocation5 + $0xf0] ss:$8 sps:$4 sm:$0xff]  }
  0x5c   :  { %715 = vmatprep.subr.bf16.mxu1 %v1436_v46  ;;  %v75_v45 = vld [vmem:[#allocation2 + $0x60] sm:$0xff]  ;;  %v81_v46 = vld [vmem:[#allocation2 + $0x90] sm:$0xff] }
  0x5e   :  { %779 = vmatpush1.bf16.msra.mxu0 %v1372_v31  ;;  %v1429_v31 = vld [vmem:[#allocation5 + $0x254] ss:$8 sps:$4 sm:$0xff]  }
  0x5f   :  { %780 = vmatprep.subr.bf16.mxu0 %v1373_v32  ;;  %716 = vmatpush1.bf16.msra.mxu1 %v1438_v49  ;;  %v107_v32 = vpack.c.bf16 %v89_v25, %v89_v25  ;;  %v1490_v49 = vld [vmem:[#allocation7 + $0x8] sm:$0xff]   ;;  %v1496_v25 = vld [vmem:[#allocation7 + $0x20] sm:$0xff]  }
  0x60   :  { %717 = vmatprep.subr.bf16.mxu1 %v1442_v50  ;;  %v1491_v50 = vld [vmem:[#allocation7 + $0x50] sm:$0xff]  }
  0x62   :  { %781 = vmatpush1.bf16.msra.mxu0 %v1375_v35  ;;  %v98_v35 = vpack.c.bf16 %v74_v30, %v68_v26  ;;  %v1497_v26 = vld [vmem:[#allocation7 + $0x68] sm:$0xff]   ;;  %v1501_v30 = vld [vmem:[#allocation7 + $0x78] sm:$0xff]  }
  0x63   :  { %782 = vmatprep.subr.bf16.mxu0 %v1376_v36  ;;  %718 = vmatpush1.bf16.msra.mxu1 %v1444_v53  ;;  %v82_v36 = vld [vmem:[#allocation2 + $0x98] sm:$0xff] }
  0x64   :  { %719 = vmatprep.subr.bf16.mxu1 %v1448_v54  ;;  %v100_v42 = vpack.c.bf16 %v82_v36, %v76_v34  ;;  %v1447_v54 = vld [vmem:[#allocation5 + $0x284] ss:$8 sps:$4 sm:$0xff]  }
  0x66   :  { %783 = vmatpush1.bf16.msra.mxu0 %v1378_v39  ;;  %v1435_v39 = vld [vmem:[#allocation5 + $0x264] ss:$8 sps:$4 sm:$0xff]  }
  0x67   :  { %784 = vmatprep.subr.bf16.mxu0 %v1379_v40  ;;  %720 = vmatpush1.bf16.msra.mxu1 %v1450_v59  ;;  %v93_v40 = vpack.c.bf16 %v69_v33, %v63_v29  ;;  %v1453_v59 = vld [vmem:[#allocation5 + $0x294] ss:$8 sps:$4 sm:$0xff]  }
  0x68   :  { %721 = vmatprep.subr.bf16.mxu1 %v1454_v60  ;;  %v1494_v60 = vld [vmem:[#allocation7 + $0x18] sm:$0xff]   ;;  %v1500_v29 = vld [vmem:[#allocation7 + $0x30] sm:$0xff]  }
  0x6a   :  { %785 = vmatpush1.bf16.msra.mxu0 %v1381_v43  ;;  %v1489_v43 = vld [vmem:[#allocation7 + $0x48] sm:$0xff]  }
  0x6b   :  { %786 = vmatprep.subr.bf16.mxu0 %v1382_v44  ;;  %722 = vmatpush1.bf16.msra.mxu1 %v1456_v1  ;;  %v1433_v44 = vld [vmem:[#allocation5 + $0x260] ss:$8 sps:$4 sm:$0xff]   ;;  %v1465_v1 = vld [vmem:[#allocation5 + $0x2b4] ss:$8 sps:$4 sm:$0xff]  }
  0x6c   :  { %723 = vmatprep.subr.bf16.mxu1 %v1460_v3  ;;  %v1471_v3 = vld [vmem:[#allocation5 + $0x2c4] ss:$8 sps:$4 sm:$0xff]  }
  0x6e   :  { %787 = vmatpush1.bf16.msra.mxu0 %v1384_v47  ;;  %v1441_v47 = vld [vmem:[#allocation5 + $0x274] ss:$8 sps:$4 sm:$0xff]  }
  0x6f   :  { %788 = vmatprep.subr.bf16.mxu0 %v1385_v48  ;;  %724 = vmatpush1.bf16.msra.mxu1 %v1462_v5  ;;  %v88_v48 = vld [vmem:[#allocation2 + $0xc8] sm:$0xff] }
  0x70   :  { %725 = vmatprep.subr.bf16.mxu1 %v1466_v13  ;;  %v106_v53 = vpack.c.bf16 %v88_v48, %v88_v48  ;;  %v1477_v5 = vld [vmem:[#allocation5 + $0x2d4] ss:$8 sps:$4 sm:$0xff]  }
  0x71   :  { %v80_v13 = vld [vmem:[#allocation2 + $0x88] sm:$0xff] }
  0x72   :  { %789 = vmatpush1.bf16.msra.mxu0 %v1387_v51  ;;  %v99_v51 = vpack.c.bf16 %v81_v46, %v75_v45 }
  0x73   :  { %790 = vmatprep.subr.bf16.mxu0 %v1391_v52  ;;  %726 = vmatpush1.bf16.msra.mxu1 %v1468_v17  ;;  %v1439_v52 = vld [vmem:[#allocation5 + $0x270] ss:$8 sps:$4 sm:$0xff]  }
  0x74   :  { %727 = vmatprep.subr.bf16.mxu1 %v1472_v19  ;;  %v79_v17 = vld [vmem:[#allocation2 + $0x80] sm:$0xff]  ;;  %v92_v19 = vld [vmem:[#allocation2 + $0xe8] sm:$0xff] }
  0x76   :  { %791 = vmatpush1.bf16.msra.mxu0 %v1393_v55  ;;  %v1492_v55 = vld [vmem:[#allocation7 + $0x10] sm:$0xff]  }
  0x77   :  { %821 = vmatprep.subr.bf16.mxu0 %v1399_v56  ;;  %728 = vmatpush1.bf16.msra.mxu1 %v1474_v21  ;;  %v1493_v56 = vld [vmem:[#allocation7 + $0x58] sm:$0xff]   ;;  %v110_v21 = vpack.c.bf16 %v92_v19, %v92_v19 }
  0x78   :  { %729 = vmatprep.subr.bf16.mxu1 %v1478_v24  ;;  %v1495_v24 = vld [vmem:[#allocation7 + $0x60] sm:$0xff]  }
  0x79   :  { %793 = vmatmul.mubr.bf16.vlgmr.msra.gmra.mrb[0].mxu0 %v95_v61  ;;  %v105_v61 = vpack.c.bf16 %v87_v58, %v87_v58 }
  0x7a   :  { %822 = vmatpush1.bf16.msra.mxu0 %v1397_v0  ;;  %802 = vmatprep.mubr.bf16.mxu0 %v102_v6  ;;  %v1457_v0 = vld [vmem:[#allocation5 + $0x2a0] ss:$8 sps:$4 sm:$0xff]   ;;  %v1475_v6 = vld [vmem:[#allocation5 + $0x2d0] ss:$8 sps:$4 sm:$0xff]  }
  0x7b   :  { %823 = vmatprep.subr.bf16.mxu0 %v1405_v2  ;;  %730 = vmatpush1.bf16.msra.mxu1 %v1480_v28  ;;  %v1463_v2 = vld [vmem:[#allocation5 + $0x2b0] ss:$8 sps:$4 sm:$0xff]  }
  0x7c   :  { %1267 = vmatprep.subr.bf16.mxu1 %v1487_v38  ;;  %v1499_v28 = vld [vmem:[#allocation7 + $0x70] sm:$0xff]  }
  0x7e   :  { %824 = vmatpush1.bf16.msra.mxu0 %v1403_v4  ;;  %732 = vmatmul.mubr.bf16.vlgmr.msra.gmra.mrb[0].mxu1 %v93_v40  ;;  %v1469_v4 = vld [vmem:[#allocation5 + $0x2c0] ss:$8 sps:$4 sm:$0xff]  }
  0x7f   :  { %825 = vmatprep.subr.bf16.mxu0 %v1411_v12  ;;  %741 = vmatprep.mubr.bf16.mxu1 %v100_v42  ;;  %v73_v12 = vld [vmem:[#allocation2 + $0x50] sm:$0xff] }
  0x80   :  { %1268 = vmatpush3.bf16.msra.mxu1 %v1488_v41  ;;  %v97_v15 = vpack.c.bf16 %v73_v12, %v67_v11 }
  0x81   :  { %803 = vmatmul.mubr.bf16.gmra.mrb[4].mxu0 %v101_v14  ;;  %1269 = vmatprep.subr.bf16.mxu1 %v1489_v43  ;;  %v86_v14 = vld [vmem:[#allocation2 + $0xb8] sm:$0xff] }
  0x82   :  { %826 = vmatpush1.bf16.msra.mxu0 %v1409_v16  ;;  %812 = vmatprep.mubr.bf16.mxu0 %v108_v22  ;;  %v104_v16 = vpack.c.bf16 %v86_v14, %v80_v13  ;;  %v91_v22 = vld [vmem:[#allocation2 + $0xe0] sm:$0xff] }
  0x83   :  { %827 = vmatprep.subr.bf16.mxu0 %v1417_v18  ;;  %v85_v18 = vld [vmem:[#allocation2 + $0xb0] sm:$0xff] }
  0x84   :  { %1270 = vmatpush3.bf16.msra.mxu1 %v1490_v49 }
  0x85   :  { %1271 = vmatprep.subr.bf16.mxu1 %v1491_v50 }
  0x86   :  { %828 = vmatpush1.bf16.msra.mxu0 %v1415_v20  ;;  %742 = vmatmul.mubr.bf16.gmra.mrb[4].mxu1 %v99_v51  ;;  %v103_v20 = vpack.c.bf16 %v85_v18, %v79_v17 }
  0x87   :  { %829 = vmatprep.subr.bf16.mxu0 %v1423_v23  ;;  %751 = vmatprep.mubr.bf16.mxu1 %v106_v53  ;;  %v109_v23 = vpack.c.bf16 %v91_v22, %v91_v22 }
  0x88   :  { %1272 = vmatpush3.bf16.msra.mxu1 %v1492_v55 }
  0x89   :  { %813 = vmatmul.mubr.bf16.gmra.mrb[8].mxu0 %v107_v32  ;;  %1273 = vmatprep.subr.bf16.mxu1 %v1493_v56 }
  0x8a   :  { %830 = vmatpush1.bf16.msra.mxu0 %v1421_v27  ;;  %853 = vmatprep.mubr.bf16.mxu0 %v98_v35  ;;  %v1498_v27 = vld [vmem:[#allocation7 + $0x28] sm:$0xff]  }
  0x8b   :  { %831 = vmatprep.subr.bf16.mxu0 %v1429_v31  ;;  %v1502_v31 = vld [vmem:[#allocation7 + $0x38] sm:$0xff]  }
  0x8c   :  { %1274 = vmatpush3.bf16.msra.mxu1 %v1494_v60 }
  0x8d   :  { %1275 = vmatprep.subr.bf16.mxu1 %v1495_v24 }
  0x8e   :  { %832 = vmatpush1.bf16.msra.mxu0 %v1427_v37  ;;  %752 = vmatmul.mubr.bf16.gmra.mrb[8].mxu1 %v105_v61 }
  0x8f   :  { %833 = vmatprep.subr.bf16.mxu0 %v1435_v39 }
  0x90   :  { %1276 = vmatpush3.bf16.msra.mxu1 %v1496_v25 }
  0x91   :  { %1277 = vmatprep.subr.bf16.mxu1 %v1497_v26 }
  0x92   :  { %834 = vmatpush1.bf16.msra.mxu0 %v1433_v44  ;;  %v209_v44 = vlaneseq }
  0x93   :  { %835 = vmatprep.subr.bf16.mxu0 %v1441_v47  ;;  %v207_v47 = vld [vmem:[%s1699_s2] sm:$0x3] }
  0x94   :  { %1278 = vmatpush3.bf16.msra.mxu1 %v1498_v27  ;;  %v210_v45 = vshrl.u32 %v209_v44, 7 }
  0x95   :  { %1279 = vmatprep.subr.bf16.mxu1 %v1499_v28 }
  0x96   :  { %836 = vmatpush1.bf16.msra.mxu0 %v1439_v52  ;;  %v211_v46 = vsub.s32 0, %v210_v45  ;;  %v215_v48 = vsub.s32 1, %v210_v45 }
  0x97   :  { %837 = vmatprep.subr.bf16.mxu0 %v1447_v54 }
  0x98   :  { %1280 = vmatpush3.bf16.msra.mxu1 %v1500_v29  ;;  %v212_v49 = vrot.slane %v207_v47, %v211_v46  ;;  %v216_v50 = vrot.slane %v207_v47, %v215_v48 }
  0x99   :  { %1281 = vmatprep.subr.bf16.mxu1 %v1501_v30 }
  0x9a   :  { %838 = vmatpush1.bf16.msra.mxu0 %v1445_v57 }
  0x9b   :  { %839 = vmatprep.subr.bf16.mxu0 %v1453_v59 }
  0x9c   :  { %1282 = vmatpush3.bf16.msra.mxu1 %v1502_v31 }
  0x9e   :  { %840 = vmatpush1.bf16.msra.mxu0 %v1451_v62 }
  0x9f   :  { %841 = vmatprep.subr.bf16.mxu0 %v1459_v63 }
  0xa2   :  { %842 = vmatpush1.bf16.msra.mxu0 %v1457_v0 }
  0xa3   :  { %843 = vmatprep.subr.bf16.mxu0 %v1465_v1 }
  0xa6   :  { %844 = vmatpush1.bf16.msra.mxu0 %v1463_v2 }
  0xa7   :  { %845 = vmatprep.subr.bf16.mxu0 %v1471_v3 }
  0xaa   :  { %846 = vmatpush1.bf16.msra.mxu0 %v1469_v4 }
  0xab   :  { %847 = vmatprep.subr.bf16.mxu0 %v1477_v5 }
  0xae   :  { %848 = vmatpush1.bf16.msra.mxu0 %v1475_v6 }
  0xaf   :  { %849 = vmatprep.subr.bf16.mxu0 %v1483_v7 }
  0xb2   :  { %850 = vmatpush1.bf16.msra.mxu0 %v1481_v8 }
  0xb3   :  { %851 = vmatprep.subr.bf16.mxu0 %v1486_v9 }
  0xb6   :  { %852 = vmatpush1.bf16.msra.mxu0 %v1484_v10 }
  0xb9   :  { %854 = vmatmul.mubr.bf16.vlgmr.msra.gmra.mrb[0].mxu0 %v97_v15 }
  0xba   :  { %863 = vmatprep.mubr.bf16.mxu0 %v104_v16 }
  0xc1   :  { %864 = vmatmul.mubr.bf16.gmra.mrb[4].mxu0 %v103_v20 }
  0xc2   :  { %873 = vmatprep.mubr.bf16.mxu0 %v110_v21 }
  0xc9   :  { %874 = vmatmul.mubr.bf16.gmra.mrb[8].mxu0 %v109_v23 }
 0x151   :  { %v733_v32 = vpop.f32.mrb[0].mxu1 }
 0x152   :  { %v735_v33 = vpop.f32.mrb[1].mxu1  ;;  %v734_v51 = vadd.f32 %v733_v32, %v212_v49 }
 0x153   :  { %v737_v34 = vpop.f32.mrb[2].mxu1  ;;  %v736_v52 = vadd.f32 %v735_v33, %v216_v50 }
 0x154   :  { %v739_v35 = vpop.f32.mrb[3].mxu1  ;;  %v738_v54 = vadd.f32 %v737_v34, %v212_v49 }
 0x155   :  { %v740_v57 = vadd.f32 %v739_v35, %v216_v50 }
 0x159   :  { %v743_v36 = vpop.f32.mrb[4].mxu1 }
 0x15a   :  { %v745_v37 = vpop.f32.mrb[5].mxu1  ;;  %v744_v1 = vadd.f32 %v743_v36, %v212_v49 }
 0x15b   :  { %v747_v38 = vpop.f32.mrb[6].mxu1  ;;  %v746_v4 = vadd.f32 %v745_v37, %v216_v50 }
 0x15c   :  { %v749_v39 = vpop.f32.mrb[7].mxu1  ;;  %v748_v8 = vadd.f32 %v747_v38, %v212_v49 }
 0x15d   :  { %v750_v11 = vadd.f32 %v749_v39, %v216_v50  ;;  %v1229_v39 = vld [vmem:[%s1701_s4] ss:$0 sm:$0xff]  ;;  %s1606_s4 = smov [#allocation8]  }
 0x15e   :  { %s1120_s10 = sshll.u32 %s1606_s4, 4  ;;  %s1121_s10 = int_to_ptr.vmem [resolvable:$true] %s1120_s10 }
 0x15f   :  { %s1569_s11 = scalar_lea.vmem %s1121_s10, 320  ;;  %p1574_p11 = scmp.lt.s32.totalorder %s1121_s10, %s1121_s10 }
 0x160   :  { %p1570_p10 = scmp.ne.s32.totalorder %s1121_s10, %s1569_s11  ;;  %p1575_p12 = scmp.lt.s32.totalorder %s1569_s11, %s1569_s11 }
 0x161   :  { %v753_v40 = vpop.f32.mrb[8].mxu1 }
 0x162   :  { %v755_v41 = vpop.f32.mrb[9].mxu1  ;;  %v754_v19 = vadd.f32 %v753_v40, %v212_v49  ;;  %p1576_p13 = por %p1575_p12, %p1574_p11 }
 0x163   :  { %v757_v42 = vpop.f32.mrb[10].mxu1  ;;  %v756_v22 = vadd.f32 %v755_v41, %v216_v50 }
 0x164   :  { %v758_v43 = vpop.f32.mrb[11].mxu1  ;;  %p1577_p0 = pnand %p1576_p13, %p1570_p10 }
 0x18c   :  { %v855_v53 = vpop.f32.mrb[0].mxu0 }
 0x18d   :  { %v1302_v55 = vadd.f32 %v855_v53, %v734_v51  ;;  %v857_v56 = vpop.f32.mrb[1].mxu0 }
 0x18e   :  { %v1304_v58 = vadd.f32 %v857_v56, %v736_v52  ;;  %v859_v59 = vpop.f32.mrb[2].mxu0 }
 0x18f   :  { %v1306_v60 = vadd.f32 %v859_v59, %v738_v54  ;;  %v861_v61 = vpop.f32.mrb[3].mxu0  ;;  %v882_v63 = vmax.f32 %v1302_v55, 0.0 }
 0x190   :  { %v1308_v62 = vadd.f32 %v861_v61, %v740_v57  ;;  %v883_v2 = vmax.f32 %v1304_v58, 0.0 }
 0x191   :  { %v884_v0 = vmax.f32 %v1306_v60, 0.0 }
 0x192   :  { %v885_v3 = vmax.f32 %v1308_v62, 0.0 }
 0x193   :  { %v892_v5 = vpack.c.bf16 %v884_v0, %v882_v63 }
 0x194   :  { %v893_v6 = vpack.c.bf16 %v885_v3, %v883_v2  ;;  %v865_v7 = vpop.f32.mrb[4].mxu0 }
 0x195   :  { %v1310_v9 = vadd.f32 %v865_v7, %v744_v1  ;;  %v867_v10 = vpop.f32.mrb[5].mxu0 }
 0x196   :  { %v1312_v12 = vadd.f32 %v867_v10, %v746_v4  ;;  %v869_v13 = vpop.f32.mrb[6].mxu0  ;;  %1065 = vmatprep.mubr.bf16.mxu1 %v893_v6 }
 0x197   :  { %v1314_v14 = vadd.f32 %v869_v13, %v748_v8  ;;  %v871_v15 = vpop.f32.mrb[7].mxu0  ;;  %1066 = vmatmul.mubr.bf16.vlgmr.msra.gmra.mrb[12].mxu1 %v892_v5  ;;  %v886_v17 = vmax.f32 %v1310_v9, 0.0 }
 0x198   :  { %v1316_v16 = vadd.f32 %v871_v15, %v750_v11  ;;  %v887_v20 = vmax.f32 %v1312_v12, 0.0 }
 0x199   :  { %v888_v18 = vmax.f32 %v1314_v14, 0.0 }
 0x19a   :  { %v889_v21 = vmax.f32 %v1316_v16, 0.0 }
 0x19b   :  { %v894_v23 = vpack.c.bf16 %v888_v18, %v886_v17 }
 0x19c   :  { %v895_v24 = vpack.c.bf16 %v889_v21, %v887_v20  ;;  %v875_v25 = vpop.f32.mrb[8].mxu0 }
 0x19d   :  { %v1318_v26 = vadd.f32 %v875_v25, %v754_v19  ;;  %v877_v27 = vpop.f32.mrb[9].mxu0 }
 0x19e   :  { %v1320_v28 = vadd.f32 %v877_v27, %v756_v22  ;;  %v879_v29 = vpop.f32.mrb[10].mxu0  ;;  %1073 = vmatprep.mubr.bf16.mxu1 %v895_v24 }
 0x19f   :  { %v880_v30 = vpop.f32.mrb[11].mxu0  ;;  %1074 = vmatmul.mubr.bf16.gmra.mrb[16].mxu1 %v894_v23  ;;  %v890_v32 = vmax.f32 %v1318_v26, 0.0 }
 0x1a0   :  { %v891_v31 = vmax.f32 %v1320_v28, 0.0 }
 0x1a1   :  { %v896_v34 = vpack.c.bf16 %v890_v32, %v890_v32 }
 0x1a2   :  { %v897_v33 = vpack.c.bf16 %v891_v31, %v891_v31 }
 0x1a4   :  { %1081 = vmatprep.mubr.bf16.mxu1 %v897_v33 }
 0x1a7   :  { %1082 = vmatmul.mubr.bf16.gmra.mrb[20].mxu1 %v896_v34 }
 0x26a   :  { %v1283_v35 = vpop.f32.mrb[12].mxu1 }
 0x26b   :  { %v1284_v36 = vpop.f32.mrb[13].mxu1 }
 0x26c   :  { %v1285_v37 = vadd.f32 %v1284_v36, %v1283_v35  ;;  %v1286_v38 = vpop.f32.mrb[14].mxu1 }
 0x26d   :  { %v1287_v40 = vpop.f32.mrb[15].mxu1 }
 0x26e   :  { %v1288_v41 = vadd.f32 %v1287_v40, %v1286_v38  ;;  %v1068_v42 = vadd.f32 %v1285_v37, %v1229_v39 }
 0x270   :  { %v1071_v43 = vadd.f32 %v1288_v41, %v1229_v39 }
 0x272   :  { %v1259_v44 = vpack.c.bf16 %v1071_v43, %v1068_v42  ;;  %v1289_v45 = vpop.f32.mrb[16].mxu1 }
 0x273   :  { %v1290_v46 = vpop.f32.mrb[17].mxu1 }
 0x274   :  { %1260 = vst [vmem:[#allocation8] sm:$0xff] %v1259_v44   ;;  %v1291_v47 = vadd.f32 %v1290_v46, %v1289_v45  ;;  %v1292_v48 = vpop.f32.mrb[18].mxu1 }
 0x275   :  { %v1293_v49 = vpop.f32.mrb[19].mxu1 }
 0x276   :  { %v1294_v50 = vadd.f32 %v1293_v49, %v1292_v48  ;;  %v1076_v51 = vadd.f32 %v1291_v47, %v1229_v39 }
 0x278   :  { %v1079_v52 = vadd.f32 %v1294_v50, %v1229_v39 }
 0x27a   :  { %v1264_v53 = vpack.c.bf16 %v1079_v52, %v1076_v51  ;;  %v1295_v54 = vpop.f32.mrb[20].mxu1 }
 0x27b   :  { %v1296_v55 = vpop.f32.mrb[21].mxu1 }
 0x27c   :  { %1266 = vst [vmem:[#allocation8 + $0x8] sm:$0xff] %v1264_v53   ;;  %v1297_v56 = vadd.f32 %v1296_v55, %v1295_v54  ;;  %v1298_v57 = vpop.f32.mrb[22].mxu1 }
 0x27d   :  { %v1299_v58 = vpop.f32.mrb[23].mxu1 }
 0x27e   :  { %v1084_v59 = vadd.f32 %v1297_v56, %v1229_v39 }
 0x280   :  { %v1255_v60 = vpack.c.bf16 %v1084_v59, %v1084_v59 }
 0x282   :  { %1114 = vst [vmem:[#allocation8 + $0x10] sm:$0xf] %v1255_v60 }
 0x283   :  { %1580 = shalt.err (!%p1577_p0)
}
 0x284   :  { %s1581_s14 = scalar_lea.hbm %s1702_s5, 320 }
 0x285   :  { %p1582_p1 = scmp.ne.s32.totalorder %s1702_s5, %s1581_s14  ;;  %p1585_p2 = scmp.lt.u32.totalorder %s1581_s14, %s1702_s5 }
 0x287   :  { %p1587_p3 = pnand %p1585_p2, %p1582_p1 }
 0x289   :  { %1590 = shalt.err (!%p1587_p3)
}
 0x28a   :  { %1126 = dma.vmem_to_hbm [thread:$0]  %s1121_s10, 320, %s1702_s5, [#allocation4], %s1604_s0, %s1604_s0, %s1605_s30  }
 0x28b   :  { %1595 = dma.done.wait [#allocation4], 320  }
 0x28c   :  { %1596 = vsyncadd [#allocation4], 4294966976 }
 0x28d   :  { %1130 = vsyncpa [#allocation3], 1 }
 0x28e   :  { %1131 = vsyncpa [#allocation6], 1 }
 0x28f   :  { %1132 = vsyncpa [#allocation4], 1 }

</bundles_post_ra>
